<compile_context>
chip_gen: v5e
topology: v5e:2x2
jax: 0.10.0
libtpu: 0.0.40
codegen_flags: <defaults>
</compile_context>

<pallas_src>
import functools
import math

import jax
import jax.numpy as jnp
from jax.experimental import pallas as pl
from jax.experimental.pallas import tpu as pltpu

_LN_EPS = 1e-5                                   # torch.nn.LayerNorm default
_MASK_MIN = float(jnp.finfo(jnp.float32).min)    # torch.finfo(torch.float).min


def _pick_tile(n, cap):
    """Largest power-of-two tile <= cap that divides n; falls back to n (full dim)."""
    t = cap
    while t >= 8:
        if t <= n and n % t == 0:
            return t
        t //= 2
    return n


def _layer_norm(x, gamma, beta):
    mu = jnp.mean(x, axis=-1, keepdims=True)
    var = jnp.mean(jnp.square(x - mu), axis=-1, keepdims=True)
    return (x - mu) * jax.lax.rsqrt(var + _LN_EPS) * gamma + beta


# --------------------------------------------------------------------------- #
# Kernel 1: MultiHeadAttention + dropout(id) + residual + LayerNorm
# --------------------------------------------------------------------------- #
def _mha_ln_kernel(*refs, n_head, causal, fuse_qkv):
    if fuse_qkv:
        (xq_ref, amask_ref, wqkv_ref, bqkv_ref, wo_ref, bo_ref,
         g_ref, beta_ref, out_ref, ctx_ref) = refs
        xkv_ref = xq_ref
    else:
        (xq_ref, xkv_ref, amask_ref, wqkv_ref, bqkv_ref, wo_ref, bo_ref,
         g_ref, beta_ref, out_ref, ctx_ref) = refs

    xq = xq_ref[0]                        # (TQ, H) f32; also the residual input
    TQ, H = xq.shape
    Sk = xkv_ref.shape[1]
    hd = H // n_head
    scale = 1.0 / math.sqrt(hd)

    wqkv = wqkv_ref[...]                  # (H, 3H) bf16
    bqkv = bqkv_ref[...]                  # (1, 3H) f32
    xq_b = xq.astype(jnp.bfloat16)

    # ---- fused projections: one (H, 3H) MXU pass for self-attention, or
    #      Q + fused (H, 2H) KV pass for cross-attention / tiled queries. ----
    if fuse_qkv:
        qkv = jnp.dot(xq_b, wqkv, preferred_element_type=jnp.float32) + bqkv
        q_all = qkv[:, :H]
        k_all = qkv[:, H:2 * H]
        v_all = qkv[:, 2 * H:]
    else:
        xkv_b = xkv_ref[0].astype(jnp.bfloat16)
        q_all = jnp.dot(xq_b, wqkv[:, :H],
                        preferred_element_type=jnp.float32) + bqkv[:, :H]
        kv = jnp.dot(xkv_b, wqkv[:, H:],
                     preferred_element_type=jnp.float32) + bqkv[:, H:]
        k_all = kv[:, :H]
        v_all = kv[:, H:]

    # ---- additive mask bias built in-kernel from the raw (1, Sk) 0/1 key mask;
    #      no (B, 1, S, S) tensor is ever DMA'd.  Matches PyTorch:
    #      extended_mask = (1 - keep) * finfo(float32).min ----
    amask = amask_ref[0]                  # (1, Sk)
    if causal:
        q0 = pl.program_id(1) * TQ        # global row offset of this query tile
        rows = jax.lax.broadcasted_iota(jnp.int32, (TQ, Sk), 0) + q0
        cols = jax.lax.broadcasted_iota(jnp.int32, (TQ, Sk), 1)
        keep = jnp.where(cols <= rows, amask, 0.0)        # (TQ, Sk)
    else:
        keep = amask                                       # (1, Sk), broadcast in add
    bias = (1.0 - keep) * _MASK_MIN

    qb = q_all.astype(jnp.bfloat16)
    kb = k_all.astype(jnp.bfloat16)
    vb = v_all.astype(jnp.bfloat16)

    # ---- per-head attention; contexts written lane-sliced into one VMEM scratch
    #      so the merged (TQ, H) slab feeds a single output-projection matmul
    #      (no jnp.concatenate of narrow slabs). ----
    for h in range(n_head):
        lo = h * hd
        qh = qb[:, lo:lo + hd]
        kh = kb[:, lo:lo + hd]
        vh = vb[:, lo:lo + hd]

        # QK^T without materializing kh.T: contract the shared feature axis.
        scores = jax.lax.dot_general(
            qh, kh, (((1,), (1,)), ((), ())),
            preferred_element_type=jnp.float32) * scale    # (TQ, Sk)
        scores = scores + bias

        m = jnp.max(scores, axis=-1, keepdims=True)
        p = jnp.exp(scores - m)
        denom = jnp.sum(p, axis=-1, keepdims=True)
        p = p * pl.reciprocal(denom, approx=True)          # EUP, not a VALU divide
        # attention-prob dropout: identity (eval mode).

        ctx_ref[:, lo:lo + hd] = jnp.dot(
            p.astype(jnp.bfloat16), vh,
            preferred_element_type=jnp.float32).astype(ctx_ref.dtype)

    # ---- single lane-dense output projection + dropout(id) + residual + LayerNorm ----
    out = jnp.dot(ctx_ref[...], wo_ref[...],
                  preferred_element_type=jnp.float32) + bo_ref[...]
    y = out + xq
    out_ref[0] = _layer_norm(y, g_ref[...], beta_ref[...]).astype(out_ref.dtype)


def _mha_layer(xq, xkv, key_mask, p, *, n_head, causal, self_attn):
    """MultiHeadAttention block + dropout(id) + residual + LayerNorm."""
    B, Sq, H = xq.shape
    Sk = xkv.shape[1]
    TQ = _pick_tile(Sq, 256)
    n_qt = Sq // TQ
    fuse_qkv = self_attn and n_qt == 1

    kernel = functools.partial(_mha_ln_kernel, n_head=n_head, causal=causal,
                               fuse_qkv=fuse_qkv)

    x_inputs = [xq] if fuse_qkv else [xq, xkv]
    x_specs = [pl.BlockSpec((1, TQ, H), lambda b, q: (b, q, 0))]
    if not fuse_qkv:
        x_specs.append(pl.BlockSpec((1, Sk, H), lambda b, q: (b, 0, 0)))

    # NOTE: weight/bias index_maps are grid-invariant, so Pallas only re-DMAs them
    # when the block index changes (never).  pipeline_mode=pl.Buffered(1) would
    # additionally drop the second buffer; left at the default for portability.
    def const(shape):
        return pl.BlockSpec(shape, lambda b, q: (0,) * len(shape))

    in_specs = x_specs + [
        pl.BlockSpec((1, 1, Sk), lambda b, q: (b, 0, 0)),   # raw 0/1 key mask
        const((H, 3 * H)),                                  # fused Wqkv (bf16)
        const((1, 3 * H)),                                  # fused bqkv
        const((H, H)),                                      # Wo (bf16)
        const((1, H)),                                      # bo
        const((1, H)),                                      # LayerNorm gamma
        const((1, H)),                                      # LayerNorm beta
    ]

    return pl.pallas_call(
        kernel,
        out_shape=jax.ShapeDtypeStruct((B, Sq, H), jnp.float32),
        grid_spec=pltpu.PrefetchScalarGridSpec(
            num_scalar_prefetch=0,
            grid=(B, n_qt),
            in_specs=in_specs,
            out_specs=pl.BlockSpec((1, TQ, H), lambda b, q: (b, q, 0)),
            scratch_shapes=[pltpu.VMEM((TQ, H), jnp.bfloat16)],   # merged-head ctx
        ),
        compiler_params=pltpu.CompilerParams(
            dimension_semantics=("parallel", "parallel"),
            vmem_limit_bytes=64 * 1024 * 1024),
    )(*x_inputs, key_mask.reshape(B, 1, Sk).astype(jnp.float32),
      p["wqkv"].astype(jnp.bfloat16), p["bqkv"],
      p["wo"].astype(jnp.bfloat16), p["bo"], p["ln_g"], p["ln_b"])


# --------------------------------------------------------------------------- #
# Kernel 2: FeedForward (linear-relu-linear) + dropout(id) + residual + LayerNorm
# --------------------------------------------------------------------------- #
def _ffn_ln_kernel(x_ref, w1_ref, b1_ref, w2_ref, b2_ref, g_ref, b_ref, out_ref):
    x = x_ref[...]                                          # (TR, H) f32
    h = jnp.dot(x.astype(jnp.bfloat16), w1_ref[...],
                preferred_element_type=jnp.float32) + b1_ref[...]
    h = jnp.maximum(h, 0.0)
    y = jnp.dot(h.astype(jnp.bfloat16), w2_ref[...],
                preferred_element_type=jnp.float32) + b2_ref[...]
    y = y + x                                               # dropout(id) + residual
    out_ref[...] = _layer_norm(y, g_ref[...], b_ref[...]).astype(out_ref.dtype)


def _ffn_layer(x, p):
    B, S, H = x.shape
    inter = p["w1"].shape[1]
    rows = B * S
    TR = _pick_tile(rows, 512)
    out = pl.pallas_call(
        _ffn_ln_kernel,
        out_shape=jax.ShapeDtypeStruct((rows, H), jnp.float32),
        grid_spec=pltpu.PrefetchScalarGridSpec(
            num_scalar_prefetch=0,
            grid=(rows // TR,),
            in_specs=[
                pl.BlockSpec((TR, H), lambda r: (r, 0)),
                pl.BlockSpec((H, inter), lambda r: (0, 0)),
                pl.BlockSpec((1, inter), lambda r: (0, 0)),
                pl.BlockSpec((inter, H), lambda r: (0, 0)),
                pl.BlockSpec((1, H), lambda r: (0, 0)),
                pl.BlockSpec((1, H), lambda r: (0, 0)),
                pl.BlockSpec((1, H), lambda r: (0, 0)),
            ],
            out_specs=pl.BlockSpec((TR, H), lambda r: (r, 0)),
        ),
        compiler_params=pltpu.CompilerParams(
            dimension_semantics=("parallel",),
            vmem_limit_bytes=64 * 1024 * 1024),
    )(x.reshape(rows, H), p["w1"].astype(jnp.bfloat16), p["b1"],
      p["w2"].astype(jnp.bfloat16), p["b2"], p["ln_g"], p["ln_b"])
    return out.reshape(B, S, H)


# --------------------------------------------------------------------------- #
# Kernel 3: embedding add + LayerNorm      Kernel 4: output linear
# --------------------------------------------------------------------------- #
def _add_ln_kernel(a_ref, b_ref, g_ref, beta_ref, out_ref):
    y = a_ref[...] + b_ref[...]
    out_ref[...] = _layer_norm(y, g_ref[...], beta_ref[...]).astype(out_ref.dtype)


def _linear_kernel(x_ref, w_ref, b_ref, out_ref):
    out_ref[...] = (jnp.dot(x_ref[...].astype(jnp.bfloat16), w_ref[...],
                            preferred_element_type=jnp.float32)
                    + b_ref[...]).astype(out_ref.dtype)


def _embedding(p, ids):
    """Word + position embedding -> LayerNorm -> dropout(id).  Gathers in plain JAX."""
    B, S = ids.shape
    H = p["tok"].shape[1]
    tok = jnp.take(p["tok"], ids, axis=0).astype(jnp.float32)          # (B, S, H)
    pos = jnp.broadcast_to(p["pos"][:S][None], (B, S, H)).astype(jnp.float32)
    rows = B * S
    TR = _pick_tile(rows, 512)
    out = pl.pallas_call(
        _add_ln_kernel,
        out_shape=jax.ShapeDtypeStruct((rows, H), jnp.float32),
        grid_spec=pltpu.PrefetchScalarGridSpec(
            num_scalar_prefetch=0,
            grid=(rows // TR,),
            in_specs=[
                pl.BlockSpec((TR, H), lambda r: (r, 0)),
                pl.BlockSpec((TR, H), lambda r: (r, 0)),
                pl.BlockSpec((1, H), lambda r: (0, 0)),
                pl.BlockSpec((1, H), lambda r: (0, 0)),
            ],
            out_specs=pl.BlockSpec((TR, H), lambda r: (r, 0)),
        ),
        compiler_params=pltpu.CompilerParams(dimension_semantics=("parallel",)),
    )(tok.reshape(rows, H), pos.reshape(rows, H), p["ln_g"], p["ln_b"])
    return out.reshape(B, S, H)


def _linear_out(x, w, b):
    B, S, H = x.shape
    V = w.shape[1]
    rows = B * S
    TR = _pick_tile(rows, 512)
    out = pl.pallas_call(
        _linear_kernel,
        out_shape=jax.ShapeDtypeStruct((rows, V), jnp.float32),
        grid_spec=pltpu.PrefetchScalarGridSpec(
            num_scalar_prefetch=0,
            grid=(rows // TR,),
            in_specs=[
                pl.BlockSpec((TR, H), lambda r: (r, 0)),
                pl.BlockSpec((H, V), lambda r: (0, 0)),
                pl.BlockSpec((1, V), lambda r: (0, 0)),
            ],
            out_specs=pl.BlockSpec((TR, V), lambda r: (r, 0)),
        ),
        compiler_params=pltpu.CompilerParams(dimension_semantics=("parallel",)),
    )(x.reshape(rows, H), w.astype(jnp.bfloat16), b)
    return out.reshape(B, S, V)


# --------------------------------------------------------------------------- #
# Full Transformer forward (mirrors Transformer.forward, eval mode)
# --------------------------------------------------------------------------- #
def transformer_forward(params, src_ids, trg_ids,
                        src_attention_mask=None, trg_attention_mask=None, *, n_head):
    B, S_src = src_ids.shape
    _, S_trg = trg_ids.shape
    if src_attention_mask is None:
        src_attention_mask = jnp.ones((B, S_src), jnp.float32)
    if trg_attention_mask is None:
        trg_attention_mask = jnp.ones((B, S_trg), jnp.float32)

    # ---- Encoder ----
    h = _embedding(params["enc_embedding"], src_ids)
    for layer in params["enc_layers"]:
        h = _mha_layer(h, h, src_attention_mask, layer["attn"],
                       n_head=n_head, causal=False, self_attn=True)
        h = _ffn_layer(h, layer["ffn"])
    enc = h

    # ---- Decoder ----
    h = _embedding(params["dec_embedding"], trg_ids)
    for layer in params["dec_layers"]:
        h = _mha_layer(h, h, trg_attention_mask, layer["self_attn"],
                       n_head=n_head, causal=True, self_attn=True)
        h = _mha_layer(h, enc, src_attention_mask, layer["cross_attn"],
                       n_head=n_head, causal=False, self_attn=False)
        h = _ffn_layer(h, layer["ffn"])

    return _linear_out(h, params["out_w"], params["out_b"])


# --------------------------------------------------------------------------- #
# Deterministic parameters (weights stored as (in, out), i.e. torch W.T)
# --------------------------------------------------------------------------- #
def _init_params(key, enc_vocab, dec_vocab, hidden, inter, n_head,
                 enc_max_len, dec_max_len, n_layers):
    keys = iter(jax.random.split(key, 1024))

    def nxt():
        return next(keys)

    def linear(fan_in, fan_out):
        bound = 1.0 / math.sqrt(fan_in)
        w = jax.random.uniform(nxt(), (fan_in, fan_out), jnp.float32, -bound, bound)
        b = jax.random.uniform(nxt(), (1, fan_out), jnp.float32, -bound, bound)
        return w, b

    def ln_params():
        g = 1.0 + 0.05 * jax.random.normal(nxt(), (1, hidden), jnp.float32)
        b = 0.05 * jax.random.normal(nxt(), (1, hidden), jnp.float32)
        return g, b

    def mha_params():
        wq, bq = linear(hidden, hidden)
        wk, bk = linear(hidden, hidden)
        wv, bv = linear(hidden, hidden)
        wo, bo = linear(hidden, hidden)
        g, b = ln_params()
        return {"wqkv": jnp.concatenate([wq, wk, wv], axis=1),
                "bqkv": jnp.concatenate([bq, bk, bv], axis=1),
                "wo": wo, "bo": bo, "ln_g": g, "ln_b": b}

    def ffn_params():
        w1, b1 = linear(hidden, inter)
        w2, b2 = linear(inter, hidden)
        g, b = ln_params()
        return {"w1": w1, "b1": b1, "w2": w2, "b2": b2, "ln_g": g, "ln_b": b}

    def emb_params(vocab, max_len):
        tok = 0.02 * jax.random.normal(nxt(), (vocab, hidden), jnp.float32)
        pos = 0.02 * jax.random.normal(nxt(), (max_len, hidden), jnp.float32)
        g, b = ln_params()
        return {"tok": tok, "pos": pos, "ln_g": g, "ln_b": b}

    enc_layers = [{"attn": mha_params(), "ffn": ffn_params()} for _ in range(n_layers)]
    dec_layers = [{"self_attn": mha_params(), "cross_attn": mha_params(),
                   "ffn": ffn_params()} for _ in range(n_layers)]
    out_w, out_b = linear(hidden, dec_vocab)
    return {"enc_embedding": emb_params(enc_vocab, enc_max_len),
            "dec_embedding": emb_params(dec_vocab, dec_max_len),
            "enc_layers": enc_layers, "dec_layers": dec_layers,
            "out_w": out_w, "out_b": out_b}


# --------------------------------------------------------------------------- #
# Pure-JAX (float32) reference mirroring the PyTorch module
# --------------------------------------------------------------------------- #
def _reference_forward(params, src_ids, trg_ids, src_mask, trg_mask, *, n_head):
    def ln(x, g, b):
        mu = x.mean(-1, keepdims=True)
        var = ((x - mu) ** 2).mean(-1, keepdims=True)
        return (x - mu) / jnp.sqrt(var + _LN_EPS) * g + b

    def ext_mask(a):                                   # (B,S) -> (B,1,1,S)
        return (1.0 - a[:, None, None, :]) * _MASK_MIN

    def causal_ext_mask(a):                            # (B,S) -> (B,1,S,S)
        S = a.shape[1]
        ids = jnp.arange(S)
        causal = (ids[None, :] <= ids[:, None]).astype(a.dtype)      # [i, j] = j <= i
        ext = causal[None, :, :] * a[:, None, :]
        return ((1.0 - ext) * _MASK_MIN)[:, None, :, :]

    def mha(q_in, k_in, v_in, mask4, mp):
        B, Sq, H = q_in.shape
        Sk = k_in.shape[1]
        hd = H // n_head
        wqkv, bqkv = mp["wqkv"], mp["bqkv"]
        q = q_in @ wqkv[:, :H] + bqkv[:, :H]
        k = k_in @ wqkv[:, H:2 * H] + bqkv[:, H:2 * H]
        v = v_in @ wqkv[:, 2 * H:] + bqkv[:, 2 * H:]
        split = lambda x, S: x.reshape(B, S, n_head, hd).transpose(0, 2, 1, 3)
        q, k, v = split(q, Sq), split(k, Sk), split(v, Sk)
        scores = q @ k.transpose(0, 1, 3, 2) / math.sqrt(hd) + mask4
        probs = jax.nn.softmax(scores, axis=-1)
        ctx = (probs @ v).transpose(0, 2, 1, 3).reshape(B, Sq, H)
        return ctx @ mp["wo"] + mp["bo"]

    def ffn(x, fp):
        h = jnp.maximum(x @ fp["w1"] + fp["b1"], 0.0)
        y = h @ fp["w2"] + fp["b2"]
        return ln(y + x, fp["ln_g"], fp["ln_b"])

    def embed(ep, ids):
        tok = jnp.take(ep["tok"], ids, axis=0)
        pos = ep["pos"][: ids.shape[1]][None]
        return ln(tok + pos, ep["ln_g"], ep["ln_b"])

    src_ext = ext_mask(src_mask)
    trg_ext = causal_ext_mask(trg_mask)

    h = embed(params["enc_embedding"], src_ids)
    for layer in params["enc_layers"]:
        a = mha(h, h, h, src_ext, layer["attn"])
        h = ln(a + h, layer["attn"]["ln_g"], layer["attn"]["ln_b"])
        h = ffn(h, layer["ffn"])
    enc = h

    h = embed(params["dec_embedding"], trg_ids)
    for layer in params["dec_layers"]:
        a = mha(h, h, h, trg_ext, layer["self_attn"])
        h = ln(a + h, layer["self_attn"]["ln_g"], layer["self_attn"]["ln_b"])
        a = mha(h, enc, enc, src_ext, layer["cross_attn"])
        h = ln(a + h, layer["cross_attn"]["ln_g"], layer["cross_attn"]["ln_b"])
        h = ffn(h, layer["ffn"])

    return h @ params["out_w"] + params["out_b"]


if __name__ == "__main__":
    B = 2
    S_SRC, S_TRG = 8, 8
    HIDDEN, N_HEAD, INTER = 32, 4, 64
    ENC_VOCAB, DEC_VOCAB = 64, 96
    MAX_LEN = 16
    N_LAYERS = 2

    key = jax.random.PRNGKey(0)
    kp, k_src, k_trg = jax.random.split(key, 3)
    params = _init_params(kp, ENC_VOCAB, DEC_VOCAB, HIDDEN, INTER, N_HEAD,
                          MAX_LEN, MAX_LEN, N_LAYERS)

    src_ids = jax.random.randint(k_src, (B, S_SRC), 0, ENC_VOCAB)
    trg_ids = jax.random.randint(k_trg, (B, S_TRG), 0, DEC_VOCAB)
    # raw 0/1 attention masks (as in Transformer.forward); include some padding
    src_mask = jnp.ones((B, S_SRC), jnp.float32).at[1, -1].set(0.0)
    trg_mask = jnp.ones((B, S_TRG), jnp.float32).at[0, -1].set(0.0)

    out = transformer_forward(params, src_ids, trg_ids, src_mask, trg_mask,
                              n_head=N_HEAD)
    out = jax.block_until_ready(out)
    assert out.shape == (B, S_TRG, DEC_VOCAB)

    ref = _reference_forward(params, src_ids, trg_ids, src_mask, trg_mask,
                             n_head=N_HEAD)
    # Kernels use bf16 MXU inputs (f32 accumulation) + approx reciprocal, so a
    # small drift vs. the pure-f32 reference is expected across the stacked layers.
    err = float(jnp.max(jnp.abs(out - ref)))
    assert err < 1e-1, f"kernel/reference mismatch: max |diff| = {err}"

    print("KERNEL_OK")
</pallas_src>

<mosaic_0001>
module attributes {stable_mosaic.version = 11 : i64} {
  func.func @_add_ln_kernel(%arg0: i32, %arg1: memref<16x32xf32, #tpu.memory_space<vmem>>, %arg2: memref<16x32xf32, #tpu.memory_space<vmem>>, %arg3: memref<1x32xf32, #tpu.memory_space<vmem>>, %arg4: memref<1x32xf32, #tpu.memory_space<vmem>>, %arg5: memref<16x32xf32, #tpu.memory_space<vmem>>) attributes {dimension_semantics = [#tpu.dimension_semantics<parallel>], iteration_bounds = array<i64: 1>, scalar_prefetch = 0 : i64, scratch_operands = 0 : i64, tpu.core_type = #tpu.core_type<tc>, window_params = [{transform_indices = @transform_0, window_bounds = array<i64: 16, 32>}, {transform_indices = @transform_1, window_bounds = array<i64: 16, 32>}, {pipeline_mode = #tpu.pipeline_mode<synchronous>, transform_indices = @transform_2, window_bounds = array<i64: 1, 32>}, {pipeline_mode = #tpu.pipeline_mode<synchronous>, transform_indices = @transform_3, window_bounds = array<i64: 1, 32>}, {transform_indices = @transform_4, window_bounds = array<i64: 16, 32>}]} {
    %c0 = arith.constant 0 : index
    %c0_0 = arith.constant 0 : index
    %0 = vector.load %arg1[%c0, %c0_0] : memref<16x32xf32, #tpu.memory_space<vmem>>, vector<16x32xf32>
    %c0_1 = arith.constant 0 : index
    %c0_2 = arith.constant 0 : index
    %1 = vector.load %arg2[%c0_1, %c0_2] : memref<16x32xf32, #tpu.memory_space<vmem>>, vector<16x32xf32>
    %2 = arith.addf %0, %1 : vector<16x32xf32>
    %c0_3 = arith.constant 0 : index
    %c0_4 = arith.constant 0 : index
    %3 = vector.load %arg3[%c0_3, %c0_4] : memref<1x32xf32, #tpu.memory_space<vmem>>, vector<1x32xf32>
    %c0_5 = arith.constant 0 : index
    %c0_6 = arith.constant 0 : index
    %4 = vector.load %arg4[%c0_5, %c0_6] : memref<1x32xf32, #tpu.memory_space<vmem>>, vector<1x32xf32>
    %cst = arith.constant dense<0.000000e+00> : vector<16xf32>
    %5 = vector.multi_reduction <add>, %2, %cst [1] : vector<16x32xf32> to vector<16xf32>
    %6 = vector.shape_cast %5 : vector<16xf32> to vector<16x1xf32>
    %cst_7 = arith.constant 3.200000e+01 : f32
    %7 = vector.broadcast %cst_7 : f32 to vector<16x1xf32>
    %8 = arith.divf %6, %7 : vector<16x1xf32>
    %9 = vector.broadcast %8 : vector<16x1xf32> to vector<16x32xf32>
    %10 = arith.subf %2, %9 : vector<16x32xf32>
    %11 = arith.mulf %10, %10 : vector<16x32xf32>
    %cst_8 = arith.constant dense<0.000000e+00> : vector<16xf32>
    %12 = vector.multi_reduction <add>, %11, %cst_8 [1] : vector<16x32xf32> to vector<16xf32>
    %13 = vector.shape_cast %12 : vector<16xf32> to vector<16x1xf32>
    %cst_9 = arith.constant 3.200000e+01 : f32
    %14 = vector.broadcast %cst_9 : f32 to vector<16x1xf32>
    %15 = arith.divf %13, %14 : vector<16x1xf32>
    %16 = vector.broadcast %8 : vector<16x1xf32> to vector<16x32xf32>
    %17 = arith.subf %2, %16 : vector<16x32xf32>
    %cst_10 = arith.constant 9.99999974E-6 : f32
    %18 = vector.broadcast %cst_10 : f32 to vector<16x1xf32>
    %19 = arith.addf %15, %18 : vector<16x1xf32>
    %20 = math.rsqrt %19 : vector<16x1xf32>
    %21 = vector.broadcast %20 : vector<16x1xf32> to vector<16x32xf32>
    %22 = arith.mulf %17, %21 : vector<16x32xf32>
    %23 = vector.broadcast %3 : vector<1x32xf32> to vector<16x32xf32>
    %24 = arith.mulf %22, %23 : vector<16x32xf32>
    %25 = vector.broadcast %4 : vector<1x32xf32> to vector<16x32xf32>
    %26 = arith.addf %24, %25 : vector<16x32xf32>
    %c0_11 = arith.constant 0 : index
    %c0_12 = arith.constant 0 : index
    %27 = vector.load %arg5[%c0_11, %c0_12] : memref<16x32xf32, #tpu.memory_space<vmem>>, vector<16x32xf32>
    tpu.vector_store %arg5[%c0_11, %c0_12], %26 {strides = array<i32>} : memref<16x32xf32, #tpu.memory_space<vmem>>, vector<16x32xf32>,
    return
  }
  func.func @transform_0(%arg0: i32) -> (i32, i32) {
    %c0_i32 = arith.constant 0 : i32
    %c0_i32_0 = arith.constant 0 : i32
    return %arg0, %c0_i32 : i32, i32
  }
  func.func @transform_1(%arg0: i32) -> (i32, i32) {
    %c0_i32 = arith.constant 0 : i32
    %c0_i32_0 = arith.constant 0 : i32
    return %arg0, %c0_i32 : i32, i32
  }
  func.func @transform_2(%arg0: i32) -> (i32, i32) {
    %c0_i32 = arith.constant 0 : i32
    %c0_i32_0 = arith.constant 0 : i32
    %c0_i32_1 = arith.constant 0 : i32
    return %c0_i32, %c0_i32_0 : i32, i32
  }
  func.func @transform_3(%arg0: i32) -> (i32, i32) {
    %c0_i32 = arith.constant 0 : i32
    %c0_i32_0 = arith.constant 0 : i32
    %c0_i32_1 = arith.constant 0 : i32
    return %c0_i32, %c0_i32_0 : i32, i32
  }
  func.func @transform_4(%arg0: i32) -> (i32, i32) {
    %c0_i32 = arith.constant 0 : i32
    %c0_i32_0 = arith.constant 0 : i32
    return %arg0, %c0_i32 : i32, i32
  }
}

</mosaic_0001>

<bundles_post_ra>
// kernel: tpu_custom_call.1
= control target key start
LH: loop header
LB: loop body
LE: loop exit
PB: predicated region body
PF: predicated region fallthrough
CT: control target
= control target key end

     0   :  { %9 = vsyncpa [#allocation3], 0  ;;  %s295_s0 = inlined_call_operand.hbm [shape: f32[16,32], index: 0, kind: input, shape index: {}]   ;;  %s296_s1 = inlined_call_operand.hbm [shape: f32[16,32], index: 1, kind: input, shape index: {}]   ;;  %s297_s2 = inlined_call_operand.vmem [shape: f32[1,32], index: 2, kind: input, shape index: {}]   ;;  %s298_s3 = inlined_call_operand.vmem [shape: f32[1,32], index: 3, kind: input, shape index: {}]   ;;  %s299_s4 = inlined_call_operand.hbm [shape: f32[16,32], index: 4, kind: output, shape index: {}]  }
   0x1   :  { %10 = vsyncpa [#allocation6], 0 }
   0x2   :  { %11 = vsyncpa [#allocation4], 0  ;;  %s16_s17 = sshll.u32 %s295_s0, 4  ;;  %s234_s18 = smov [#allocation2]   ;;  %s17_s17 = int_to_ptr.hbm [resolvable:$true] %s16_s17 }
   0x3   :  { %s18_s19 = sshll.u32 %s234_s18, 4  ;;  %s29_s22 = sshll.u32 %s296_s1, 4  ;;  %s19_s19 = int_to_ptr.vmem [resolvable:$true] %s18_s19  ;;  %s30_s22 = int_to_ptr.hbm [resolvable:$true] %s29_s22 }
   0x4   :  { %s235_s23 = smov 128   ;;  %s236_s24 = smov 8  }
   0x5   :  { %24 = dma.hbm_to_vmem [thread:$0]  %s17_s17, 256, %s19_s19, [#allocation3], %s235_s23, %s235_s23, %s236_s24  }
   0x6   :  { %s237_s25 = smov [#allocation5]  }
   0x7   :  { %s31_s26 = sshll.u32 %s237_s25, 4  ;;  %s32_s26 = int_to_ptr.vmem [resolvable:$true] %s31_s26 }
   0x8   :  { %37 = dma.hbm_to_vmem [thread:$0]  %s30_s22, 256, %s32_s26, [#allocation6], %s235_s23, %s235_s23, %s236_s24  }
   0x9   :  { %228 = dma.done.wait [#allocation3], 256  }
   0xa   :  { %229 = vsyncadd [#allocation3], 4294967040 }
   0xb   :  { %230 = dma.done.wait [#allocation6], 256  }
   0xc   :  { %231 = vsyncadd [#allocation6], 4294967040  ;;  %v50_v0 = vld [vmem:[#allocation2] sm:$0xff]  ;;  %v52_v1 = vld [vmem:[#allocation5] sm:$0xff]  ;;  %vm58_vm0 = vcmask 261120   ;;  %v238_v8 = vmov 32.0  }
   0xd   :  { %v54_v2 = vadd.f32 %v52_v1, %v50_v0  ;;  %v51_v3 = vld [vmem:[#allocation2 + $0x8] sm:$0xff]  ;;  %v53_v4 = vld [vmem:[#allocation5 + $0x8] sm:$0xff]  ;;  %150 = vrcp.f32 %v238_v8  ;;  %v148_v39 = vld [vmem:[%s297_s2] ss:$0 sm:$0xff]  ;;  %s239_s2 = smov [#allocation7]   ;;  %s128_s6 = sshll.u32 %s299_s4, 4  ;;  %s129_s6 = int_to_ptr.hbm [resolvable:$true] %s128_s6 }
   0xe   :  { %v55_v6 = vadd.f32 %v53_v4, %v51_v3  ;;  %v149_v43 = vld [vmem:[%s298_s3] ss:$0 sm:$0xff]  ;;  %s126_s29 = sshll.u32 %s239_s2, 4  ;;  %s127_s29 = int_to_ptr.vmem [resolvable:$true] %s126_s29 }
   0xf   :  { %v59_v5 = vsel %vm58_vm0, %v54_v2, 0.0 }
  0x10   :  { %60 = vadd.xlane.f32.xlu0 %v59_v5  ;;  %v62_v7 = vsel %vm58_vm0, %v55_v6, 0.0 }
  0x13   :  { %v151_v9 = vpop.eup %150 }
  0x14   :  { %v66_v10 = vmul.f32 32.0, %v151_v9  ;;  %vm70_vm1 = vweird.f32 %v151_v9 }
  0x16   :  { %v67_v11 = vsub.f32 1.0, %v66_v10 }
  0x18   :  { %63 = vadd.xlane.f32.xlu0 %v62_v7  ;;  %v68_v12 = vmul.f32 %v151_v9, %v67_v11 }
  0x1a   :  { %v69_v13 = vadd.f32 %v151_v9, %v68_v12 }
  0x1c   :  { %v71_v14 = vsel %vm70_vm1, %v151_v9, %v69_v13 }
  0x83   :  { %v61_v15 = vpop.xlane.xlu0 %60 }
  0x84   :  { %v72_v16 = vmul.f32 %v71_v14, %v61_v15 }
  0x86   :  { %v74_v17 = vsub.f32 %v54_v2, %v72_v16 }
  0x88   :  { %v76_v18 = vmul.f32 %v74_v17, %v74_v17 }
  0x8a   :  { %v78_v19 = vsel %vm58_vm0, %v76_v18, 0.0 }
  0x8b   :  { %79 = vadd.xlane.f32.xlu1 %v78_v19  ;;  %v64_v20 = vpop.xlane.xlu0 %63 }
  0x8c   :  { %v73_v21 = vmul.f32 %v71_v14, %v64_v20 }
  0x8e   :  { %v75_v22 = vsub.f32 %v55_v6, %v73_v21 }
  0x90   :  { %v77_v23 = vmul.f32 %v75_v22, %v75_v22 }
  0x92   :  { %v81_v24 = vsel %vm58_vm0, %v77_v23, 0.0 }
  0x93   :  { %82 = vadd.xlane.f32.xlu1 %v81_v24 }
  0xfe   :  { %v80_v25 = vpop.xlane.xlu1 %79 }
  0xff   :  { %v84_v26 = vmul.f32 %v80_v25, %v71_v14 }
 0x101   :  { %v86_v27 = vadd.f32 1e-05, %v84_v26 }
 0x103   :  { %152 = vrsqrt.f32 %v86_v27  ;;  %vm94_vm3 = vweird.f32 %v86_v27 }
 0x106   :  { %v83_v28 = vpop.xlane.xlu1 %82 }
 0x107   :  { %v85_v29 = vmul.f32 %v83_v28, %v71_v14 }
 0x109   :  { %v153_v30 = vpop.eup %152  ;;  %v87_v31 = vadd.f32 1e-05, %v85_v29 }
 0x10a   :  { %v89_v32 = vmul.f32 %v153_v30, %v86_v27  ;;  %vm95_vm2 = vweird.f32 %v153_v30 }
 0x10b   :  { %154 = vrsqrt.f32 %v87_v31  ;;  %vm96_vm4 = vmor %vm94_vm3, %vm95_vm2  ;;  %vm104_vm6 = vweird.f32 %v87_v31 }
 0x10c   :  { %v90_v33 = vmul.f32 %v153_v30, %v89_v32 }
 0x10e   :  { %v91_v34 = vmul.f32 0.5, %v90_v33 }
 0x110   :  { %v92_v35 = vsub.f32 1.5, %v91_v34 }
 0x111   :  { %v155_v36 = vpop.eup %154 }
 0x112   :  { %v93_v37 = vmul.f32 %v153_v30, %v92_v35  ;;  %v99_v38 = vmul.f32 %v155_v36, %v87_v31  ;;  %vm105_vm5 = vweird.f32 %v155_v36 }
 0x113   :  { %vm106_vm7 = vmor %vm104_vm6, %vm105_vm5 }
 0x114   :  { %v97_v40 = vsel %vm96_vm4, %v153_v30, %v93_v37  ;;  %v100_v41 = vmul.f32 %v155_v36, %v99_v38 }
 0x115   :  { %v108_v42 = vmul.f32 %v97_v40, %v74_v17 }
 0x116   :  { %v101_v44 = vmul.f32 0.5, %v100_v41 }
 0x117   :  { %v113_v45 = vmul.f32 %v148_v39, %v108_v42 }
 0x118   :  { %v102_v46 = vsub.f32 1.5, %v101_v44 }
 0x119   :  { %v118_v47 = vadd.f32 %v149_v43, %v113_v45 }
 0x11a   :  { %v103_v48 = vmul.f32 %v155_v36, %v102_v46 }
 0x11b   :  { %120 = vst.msk [vmem:[#allocation7] sm:$0xff] %vm58_vm0, %v118_v47 }
 0x11c   :  { %v107_v49 = vsel %vm106_vm7, %v155_v36, %v103_v48 }
 0x11d   :  { %v109_v50 = vmul.f32 %v107_v49, %v75_v22 }
 0x11f   :  { %v114_v51 = vmul.f32 %v148_v39, %v109_v50 }
 0x121   :  { %v119_v52 = vadd.f32 %v149_v43, %v114_v51 }
 0x123   :  { %121 = vst.msk [vmem:[#allocation7 + $0x8] sm:$0xff] %vm58_vm0, %v119_v52 }
 0x124   :  { %134 = dma.vmem_to_hbm [thread:$0]  %s127_s29, 256, %s129_s6, [#allocation4], %s235_s23, %s235_s23, %s236_s24  }
 0x125   :  { %232 = dma.done.wait [#allocation4], 256  }
 0x126   :  { %233 = vsyncadd [#allocation4], 4294967040 }
 0x127   :  { %139 = vsyncpa [#allocation3], 1 }
 0x128   :  { %140 = vsyncpa [#allocation6], 1 }
 0x129   :  { %141 = vsyncpa [#allocation4], 1 }

</bundles_post_ra>
